<compile_context>
chip_gen: v7x
topology: tpu7x:2x2x1
jax: 0.10.0
libtpu: 0.0.40
codegen_flags: <defaults>
</compile_context>

<pallas_src>
import functools

import jax
import jax.numpy as jnp
from jax import lax
from jax.experimental import pallas as pl
from jax.experimental.pallas import tpu as pltpu


def _round_up(v, m):
    return (v + m - 1) // m * m


def _focal_loss_kernel(x_ref, t_ref, a_ref, o_ref, acc_ref, *,
                       gamma, n_rows, tile_n):
    s = pl.program_id(0)                      # per-core split (parallel axis)
    i = pl.program_id(1)                      # batch tile within the split
    last = pl.num_programs(1) - 1

    # Zero this split's per-row accumulator on its first batch tile.
    @pl.when(i == 0)
    def _():
        acc_ref[...] = jnp.zeros_like(acc_ref)

    x = x_ref[...].astype(jnp.float32)        # (tile_n, C) logits, cast after DMA
    t = t_ref[...]                            # (tile_n, 1) int32 targets
    a_t = a_ref[...]                          # (tile_n, 1) f32 alpha[target]

    # Global-row validity mask: handles the ragged last tile and any phantom
    # tiles from the per-core split rounding.  OOB rows read undefined data
    # and are dropped here, so the wrapper never pads / copies logits in HBM.
    row0 = (s * pl.num_programs(1) + i) * tile_n
    rows = row0 + lax.broadcasted_iota(jnp.int32, (x.shape[0], 1), 0)
    valid = rows < n_rows

    # Boolean one-hot select of the true-class logit (no float mask, no
    # full-tile multiply; the scatter_ equivalent of the PyTorch module).
    col = lax.broadcasted_iota(jnp.int32, x.shape, 1)
    sel = col == t

    # Log-sum-exp softmax of the true class: no (N, C) divide, no log(0).
    m = jnp.max(x, axis=1, keepdims=True)                       # (tile_n, 1)
    se = jnp.sum(jnp.exp(x - m), axis=1, keepdims=True)         # (tile_n, 1)
    x_t = jnp.sum(jnp.where(sel, x, 0.0), axis=1, keepdims=True)

    log_p = x_t - m - jnp.log(se)                               # log softmax[tgt]
    p = jnp.exp(log_p)                                          # softmax[tgt]

    g = float(gamma)
    if g.is_integer() and 0 <= g <= 8:
        # Integer gamma: plain VPU multiplies.  Clamp guards p rounding to
        # slightly > 1 in f32 (would flip the sign of a near-zero term).
        one_m_p = jnp.maximum(1.0 - p, 0.0)
        focal = jnp.ones_like(p)
        for _ in range(int(g)):
            focal = focal * one_m_p
    else:
        focal = jnp.where(p < 1.0,
                          jnp.exp(g * jnp.log1p(-jnp.minimum(p, 1.0))),
                          0.0)

    row_loss = -a_t * focal * log_p                             # (tile_n, 1)
    acc_ref[...] += jnp.where(valid, row_loss, 0.0)

    # One cross-sublane reduce + output store per split (not per tile).
    @pl.when(i == last)
    def _():
        o_ref[...] = jnp.zeros_like(o_ref) + jnp.sum(acc_ref[...])


def focal_loss(inputs, targets, alpha=None, gamma=2.0, size_average=True,
               tile_n=None):
    """Pallas TPU implementation of FocalLoss.forward.

    inputs:  (N, C) float logits (f32 / bf16 / fp16 — streamed in native dtype)
    targets: (N,)   int class indices in [0, C)
    alpha:   (C,) or (C, 1) per-class factor; defaults to ones (as in __init__).
    tile_n:  optional batch-tile override (rows), mainly for testing.
    Returns a scalar float32 loss (mean over N if size_average else sum).
    """
    n, c = inputs.shape
    if not jnp.issubdtype(inputs.dtype, jnp.floating):
        inputs = inputs.astype(jnp.float32)
    itemsize = jnp.dtype(inputs.dtype).itemsize

    targets = jnp.asarray(targets, dtype=jnp.int32).reshape(n, 1)

    # alpha[targets] gathered once in the wrapper (cheap O(N) gather) instead
    # of a full (tile_n, C) multiply + lane reduction inside the kernel.
    if alpha is None:
        alpha_t = jnp.ones((n, 1), dtype=jnp.float32)
    else:
        alpha_flat = jnp.asarray(alpha, dtype=jnp.float32).reshape(-1)
        alpha_t = alpha_flat[targets[:, 0]].reshape(n, 1)

    # ---- generation-aware tiling -------------------------------------------
    try:
        kind = jax.devices()[0].device_kind.lower()
    except Exception:  # pragma: no cover - defensive
        kind = ""
    is_v7 = "v7" in kind
    if is_v7:
        # v7x: 64 MiB VMEM / TensorCore -> keep the scoped limit <= ~48 MiB.
        work_budget, vmem_limit = 28 * 1024 * 1024, 48 * 1024 * 1024
    else:
        # v5e / v6e: 128 MiB physical VMEM -> raise well above the defaults.
        work_budget, vmem_limit = 40 * 1024 * 1024, 64 * 1024 * 1024

    # Per-row VMEM cost: double-buffered native-dtype logits row (lane-padded
    # to 128), ~5 full-tile f32 temporaries, the lane-padded int32 target and
    # f32 alpha side blocks (double-buffered), and the (tile_n, 1) f32 scratch.
    c_lanes = _round_up(c, 128)
    per_row = (c_lanes * (2 * itemsize + 20)        # inputs (x2) + f32 temps
               + 2 * 2 * 128 * 4                    # targets + alpha, x2 bufs
               + 128 * 4)                           # accumulator scratch
    sub_mult = {4: 8, 2: 16, 1: 32}.get(itemsize, 8)

    if tile_n is None:
        tile_n = work_budget // per_row
        if is_v7 and n >= 2 * sub_mult:
            # Leave at least two tiles so the batch splits across both cores.
            tile_n = min(tile_n, -(-n // (2 * sub_mult)) * sub_mult)
    tile_n = max(sub_mult, min(4096, (tile_n // sub_mult) * sub_mult))
    if tile_n >= n:
        tile_n = n            # single full-batch block (full dim is always legal)

    n_tiles = -(-n // tile_n)
    num_splits = 2 if (is_v7 and n_tiles >= 2) else 1   # one split per TensorCore
    tiles_per_split = -(-n_tiles // num_splits)

    def block_map(s, i):
        # Clamp phantom tiles (from per-core split rounding) onto the last real
        # tile; their rows fail the in-kernel `row < N` mask anyway.
        idx = jnp.minimum(s * tiles_per_split + i, n_tiles - 1)
        return (idx, 0)

    kernel = functools.partial(_focal_loss_kernel, gamma=float(gamma),
                               n_rows=n, tile_n=tile_n)

    cost = pl.CostEstimate(
        flops=int(8 * n * c + 16 * n),
        transcendentals=int(n * c + 4 * n),
        bytes_accessed=int(n * c * itemsize + 8 * n + num_splits * 8 * 128 * 4),
    )

    out = pl.pallas_call(
        kernel,
        out_shape=jax.ShapeDtypeStruct((num_splits * 8, 128), jnp.float32),
        grid=(num_splits, tiles_per_split),
        in_specs=[
            pl.BlockSpec((tile_n, c), block_map),   # logits, streamed unpadded
            pl.BlockSpec((tile_n, 1), block_map),   # int32 targets
            pl.BlockSpec((tile_n, 1), block_map),   # f32 alpha[target]
        ],
        out_specs=pl.BlockSpec((8, 128), lambda s, i: (s, 0)),
        scratch_shapes=[pltpu.VMEM((tile_n, 1), jnp.float32)],
        compiler_params=pltpu.CompilerParams(
            dimension_semantics=("parallel", "arbitrary"),
            vmem_limit_bytes=vmem_limit),
        cost_estimate=cost,
    )(inputs, targets, alpha_t)

    # Each split's (8, 128) block holds its partial sum broadcast; pick a lane.
    partials = out.reshape(num_splits, 8, 128)[:, 0, 0]
    total = jnp.sum(partials)
    if size_average:
        total = total / jnp.float32(n)   # true N, never a padded N
    return total


def _focal_loss_ref(inputs, targets, alpha, gamma, size_average):
    # Pure-JAX reference mirroring the PyTorch module.
    p = jax.nn.softmax(inputs.astype(jnp.float32), axis=1)
    mask = jax.nn.one_hot(targets, inputs.shape[1], dtype=jnp.float32)
    probs = jnp.sum(p * mask, axis=1)
    a = alpha.reshape(-1)[targets]
    batch_loss = -a * (1.0 - probs) ** gamma * jnp.log(probs)
    return jnp.mean(batch_loss) if size_average else jnp.sum(batch_loss)


if __name__ == "__main__":
    key = jax.random.PRNGKey(0)
    k1, k2 = jax.random.split(key)

    # Small shape consistent with the module (batch of 8, class_num = 4).
    N, C = 8, 4
    logits = jax.random.normal(k1, (N, C), dtype=jnp.float32)
    targets = jax.random.randint(k2, (N,), 0, C, dtype=jnp.int32)
    alpha = jnp.ones((C,), dtype=jnp.float32)  # deterministic init, as in __init__

    loss = focal_loss(logits, targets, alpha=alpha, gamma=2.0, size_average=True)
    loss = jax.block_until_ready(loss)
    ref = _focal_loss_ref(logits, targets, alpha, 2.0, True)
    assert jnp.allclose(loss, ref, rtol=1e-5, atol=1e-5), (loss, ref)

    # Ragged multi-tile path (forced small tile), both reductions, non-1 alpha.
    N2, C2 = 300, 21
    l2 = jax.random.normal(jax.random.PRNGKey(1), (N2, C2), dtype=jnp.float32)
    t2 = jax.random.randint(jax.random.PRNGKey(2), (N2,), 0, C2, dtype=jnp.int32)
    a2 = jax.random.uniform(jax.random.PRNGKey(3), (C2,), dtype=jnp.float32) + 0.5
    for sa in (True, False):
        got = jax.block_until_ready(
            focal_loss(l2, t2, alpha=a2, gamma=2.0, size_average=sa, tile_n=64))
        want = _focal_loss_ref(l2, t2, a2, 2.0, sa)
        assert jnp.allclose(got, want, rtol=1e-4, atol=1e-4), (sa, got, want)

    # Non-integer gamma branch, default (auto) tiling.
    got = jax.block_until_ready(focal_loss(l2, t2, alpha=a2, gamma=1.5))
    want = _focal_loss_ref(l2, t2, a2, 1.5, True)
    assert jnp.allclose(got, want, rtol=1e-4, atol=1e-4), (got, want)

    # bf16 streaming path: inputs stay bf16 over HBM, cast to f32 after DMA.
    l3 = l2.astype(jnp.bfloat16)
    got = jax.block_until_ready(focal_loss(l3, t2, alpha=a2, gamma=2.0))
    want = _focal_loss_ref(l3.astype(jnp.float32), t2, a2, 2.0, True)
    assert jnp.allclose(got, want, rtol=1e-3, atol=1e-3), (got, want)

    print("KERNEL_OK")
</pallas_src>

<mosaic_0001>
module attributes {stable_mosaic.version = 11 : i64} {
  func.func @_focal_loss_kernel(%arg0: i32, %arg1: i32, %arg2: memref<8x4xf32, #tpu.memory_space<vmem>>, %arg3: memref<8x1xi32, #tpu.memory_space<vmem>>, %arg4: memref<8x1xf32, #tpu.memory_space<vmem>>, %arg5: memref<8x128xf32, #tpu.memory_space<vmem>>, %arg6: memref<8x1xf32, #tpu.memory_space<vmem>>) attributes {dimension_semantics = [#tpu.dimension_semantics<parallel>, #tpu.dimension_semantics<arbitrary>], iteration_bounds = array<i64: 1, 1>, scalar_prefetch = 0 : i64, scratch_operands = 1 : i64, tpu.core_type = #tpu.core_type<tc>, window_params = [{transform_indices = @transform_0, window_bounds = array<i64: 8, 4>}, {transform_indices = @transform_1, window_bounds = array<i64: 8, 1>}, {transform_indices = @transform_2, window_bounds = array<i64: 8, 1>}, {transform_indices = @transform_3, window_bounds = array<i64: 8, 128>}]} {
    %c0_i32 = arith.constant 0 : i32
    %0 = arith.cmpi eq, %arg1, %c0_i32 : i32
    %1 = arith.extui %0 : i1 to i32
    %c0_i32_0 = arith.constant 0 : i32
    %2 = arith.cmpi ne, %1, %c0_i32_0 : i32
    scf.if %2 {
      %cst_21 = arith.constant 0.000000e+00 : f32
      %51 = vector.broadcast %cst_21 : f32 to vector<8x1xf32>
      %c0_22 = arith.constant 0 : index
      %c0_23 = arith.constant 0 : index
      %52 = vector.load %arg6[%c0_22, %c0_23] : memref<8x1xf32, #tpu.memory_space<vmem>>, vector<8x1xf32>
      tpu.vector_store %arg6[%c0_22, %c0_23], %51 {strides = array<i32>} : memref<8x1xf32, #tpu.memory_space<vmem>>, vector<8x1xf32>,
    } else {
    }
    %c0 = arith.constant 0 : index
    %c0_1 = arith.constant 0 : index
    %3 = vector.load %arg2[%c0, %c0_1] : memref<8x4xf32, #tpu.memory_space<vmem>>, vector<8x4xf32>
    %c0_2 = arith.constant 0 : index
    %c0_3 = arith.constant 0 : index
    %4 = vector.load %arg3[%c0_2, %c0_3] : memref<8x1xi32, #tpu.memory_space<vmem>>, vector<8x1xi32>
    %c0_4 = arith.constant 0 : index
    %c0_5 = arith.constant 0 : index
    %5 = vector.load %arg4[%c0_4, %c0_5] : memref<8x1xf32, #tpu.memory_space<vmem>>, vector<8x1xf32>
    %c1_i32 = arith.constant 1 : i32
    %6 = arith.muli %arg0, %c1_i32 : i32
    %7 = arith.addi %6, %arg1 : i32
    %c8_i32 = arith.constant 8 : i32
    %8 = arith.muli %7, %c8_i32 : i32
    %9 = tpu.iota {dimensions = array<i32: 0>} : vector<8x1xi32>
    %10 = vector.broadcast %8 : i32 to vector<8x1xi32>
    %11 = arith.addi %10, %9 : vector<8x1xi32>
    %c8_i32_6 = arith.constant 8 : i32
    %12 = vector.broadcast %c8_i32_6 : i32 to vector<8x1xi32>
    %13 = arith.cmpi slt, %11, %12 : vector<8x1xi32>
    %14 = tpu.iota {dimensions = array<i32: 1>} : vector<8x4xi32>
    %15 = vector.broadcast %4 : vector<8x1xi32> to vector<8x4xi32>
    %16 = arith.cmpi eq, %14, %15 : vector<8x4xi32>
    %cst = arith.constant dense<0xFF800000> : vector<8xf32>
    %17 = vector.multi_reduction <maximumf>, %3, %cst [1] : vector<8x4xf32> to vector<8xf32>
    %18 = vector.shape_cast %17 : vector<8xf32> to vector<8x1xf32>
    %19 = vector.broadcast %18 : vector<8x1xf32> to vector<8x4xf32>
    %20 = arith.subf %3, %19 : vector<8x4xf32>
    %21 = math.exp %20 : vector<8x4xf32>
    %cst_7 = arith.constant dense<0.000000e+00> : vector<8xf32>
    %22 = vector.multi_reduction <add>, %21, %cst_7 [1] : vector<8x4xf32> to vector<8xf32>
    %23 = vector.shape_cast %22 : vector<8xf32> to vector<8x1xf32>
    %cst_8 = arith.constant 0.000000e+00 : f32
    %24 = vector.broadcast %cst_8 : f32 to vector<8x4xf32>
    %25 = arith.select %16, %3, %24 : vector<8x4xi1>, vector<8x4xf32>
    %cst_9 = arith.constant dense<0.000000e+00> : vector<8xf32>
    %26 = vector.multi_reduction <add>, %25, %cst_9 [1] : vector<8x4xf32> to vector<8xf32>
    %27 = vector.shape_cast %26 : vector<8xf32> to vector<8x1xf32>
    %28 = arith.subf %27, %18 : vector<8x1xf32>
    %29 = math.log %23 : vector<8x1xf32>
    %30 = arith.subf %28, %29 : vector<8x1xf32>
    %31 = math.exp %30 : vector<8x1xf32>
    %cst_10 = arith.constant 1.000000e+00 : f32
    %32 = vector.broadcast %cst_10 : f32 to vector<8x1xf32>
    %33 = arith.subf %32, %31 : vector<8x1xf32>
    %cst_11 = arith.constant 0.000000e+00 : f32
    %34 = vector.broadcast %cst_11 : f32 to vector<8x1xf32>
    %35 = arith.maximumf %33, %34 : vector<8x1xf32>
    %cst_12 = arith.constant 1.000000e+00 : f32
    %36 = vector.broadcast %cst_12 : f32 to vector<8x1xf32>
    %37 = arith.mulf %36, %35 : vector<8x1xf32>
    %38 = arith.mulf %37, %35 : vector<8x1xf32>
    %cst_13 = arith.constant 0.000000e+00 : f32
    %39 = vector.broadcast %cst_13 : f32 to vector<8x1xf32>
    %40 = arith.subf %39, %5 : vector<8x1xf32>
    %41 = arith.mulf %40, %38 : vector<8x1xf32>
    %42 = arith.mulf %41, %30 : vector<8x1xf32>
    %c0_14 = arith.constant 0 : index
    %c0_15 = arith.constant 0 : index
    %43 = vector.load %arg6[%c0_14, %c0_15] : memref<8x1xf32, #tpu.memory_space<vmem>>, vector<8x1xf32>
    %cst_16 = arith.constant 0.000000e+00 : f32
    %44 = vector.broadcast %cst_16 : f32 to vector<8x1xf32>
    %45 = arith.select %13, %42, %44 : vector<8x1xi1>, vector<8x1xf32>
    %46 = arith.addf %43, %45 : vector<8x1xf32>
    %c0_17 = arith.constant 0 : index
    %c0_18 = arith.constant 0 : index
    %47 = vector.load %arg6[%c0_17, %c0_18] : memref<8x1xf32, #tpu.memory_space<vmem>>, vector<8x1xf32>
    tpu.vector_store %arg6[%c0_17, %c0_18], %46 {strides = array<i32>} : memref<8x1xf32, #tpu.memory_space<vmem>>, vector<8x1xf32>,
    %c0_i32_19 = arith.constant 0 : i32
    %48 = arith.cmpi eq, %arg1, %c0_i32_19 : i32
    %49 = arith.extui %48 : i1 to i32
    %c0_i32_20 = arith.constant 0 : i32
    %50 = arith.cmpi ne, %49, %c0_i32_20 : i32
    scf.if %50 {
      %cst_21 = arith.constant 0.000000e+00 : f32
      %51 = vector.broadcast %cst_21 : f32 to vector<8x128xf32>
      %c0_22 = arith.constant 0 : index
      %c0_23 = arith.constant 0 : index
      %52 = vector.load %arg6[%c0_22, %c0_23] : memref<8x1xf32, #tpu.memory_space<vmem>>, vector<8x1xf32>
      %53 = vector.shape_cast %52 : vector<8x1xf32> to vector<1x8x1xf32>
      %cst_24 = arith.constant dense<0.000000e+00> : vector<1xf32>
      %54 = vector.multi_reduction <add>, %53, %cst_24 [1, 2] : vector<1x8x1xf32> to vector<1xf32>
      %55 = vector.shape_cast %54 : vector<1xf32> to vector<1x1x1xf32>
      %56 = vector.extract %55[0, 0, 0] : f32 from vector<1x1x1xf32>
      %57 = vector.broadcast %56 : f32 to vector<8x128xf32>
      %58 = arith.addf %51, %57 : vector<8x128xf32>
      %c0_25 = arith.constant 0 : index
      %c0_26 = arith.constant 0 : index
      %59 = vector.load %arg5[%c0_25, %c0_26] : memref<8x128xf32, #tpu.memory_space<vmem>>, vector<8x128xf32>
      tpu.vector_store %arg5[%c0_25, %c0_26], %58 {strides = array<i32>} : memref<8x128xf32, #tpu.memory_space<vmem>>, vector<8x128xf32>,
    } else {
    }
    return
  }
  func.func @transform_0(%arg0: i32, %arg1: i32) -> (i32, i32) {
    %c1_i32 = arith.constant 1 : i32
    %0 = arith.muli %arg0, %c1_i32 : i32
    %1 = arith.addi %0, %arg1 : i32
    %c0_i32 = arith.constant 0 : i32
    %2 = arith.minsi %1, %c0_i32 : i32
    %c0_i32_0 = arith.constant 0 : i32
    %c0_i32_1 = arith.constant 0 : i32
    return %2, %c0_i32_0 : i32, i32
  }
  func.func @transform_1(%arg0: i32, %arg1: i32) -> (i32, i32) {
    %c1_i32 = arith.constant 1 : i32
    %0 = arith.muli %arg0, %c1_i32 : i32
    %1 = arith.addi %0, %arg1 : i32
    %c0_i32 = arith.constant 0 : i32
    %2 = arith.minsi %1, %c0_i32 : i32
    %c0_i32_0 = arith.constant 0 : i32
    %c0_i32_1 = arith.constant 0 : i32
    return %2, %c0_i32_0 : i32, i32
  }
  func.func @transform_2(%arg0: i32, %arg1: i32) -> (i32, i32) {
    %c1_i32 = arith.constant 1 : i32
    %0 = arith.muli %arg0, %c1_i32 : i32
    %1 = arith.addi %0, %arg1 : i32
    %c0_i32 = arith.constant 0 : i32
    %2 = arith.minsi %1, %c0_i32 : i32
    %c0_i32_0 = arith.constant 0 : i32
    %c0_i32_1 = arith.constant 0 : i32
    return %2, %c0_i32_0 : i32, i32
  }
  func.func @transform_3(%arg0: i32, %arg1: i32) -> (i32, i32) {
    %c0_i32 = arith.constant 0 : i32
    %c0_i32_0 = arith.constant 0 : i32
    return %arg0, %c0_i32 : i32, i32
  }
}

</mosaic_0001>

<bundles_post_ra>
// kernel: tpu_custom_call.1
= control target key start
LH: loop header
LB: loop body
LE: loop exit
PB: predicated region body
PF: predicated region fallthrough
CT: control target
= control target key end

     0   :  { %8 = vsyncpa [#allocation4], 0  ;;  %s355_s0 = inlined_call_operand.hbm [shape: f32[8,4], index: 0, kind: input, shape index: {}]   ;;  %s356_s1 = inlined_call_operand.hbm [shape: s32[8,1], index: 1, kind: input, shape index: {}]   ;;  %s357_s2 = inlined_call_operand.hbm [shape: f32[8,1], index: 2, kind: input, shape index: {}]   ;;  %s358_s3 = inlined_call_operand.hbm [shape: f32[8,128], index: 3, kind: output, shape index: {}]  }
   0x1   :  { %9 = vsyncpa [#allocation7], 0 }
   0x2   :  { %10 = vsyncpa [#allocation5], 0  ;;  %s275_s12 = smov [#allocation6]   ;;  %s276_s14 = smov [#allocation3]  }
   0x3   :  { %s37_s13 = sshll.u32 %s275_s12, 4  ;;  %s22_s15 = sshll.u32 %s276_s14, 4  ;;  %s38_s13 = int_to_ptr.vmem [resolvable:$true] %s37_s13  ;;  %s23_s15 = int_to_ptr.vmem [resolvable:$true] %s22_s15 }
   0x4   :  { %s181_s18 = scalar_lea.hbm %s356_s1, 128 }
   0x5   :  { %p182_p0 = scmp.ne.s32.totalorder %s356_s1, %s181_s18  ;;  %p185_p1 = scmp.lt.u32.totalorder %s181_s18, %s356_s1 }
   0x7   :  { %p187_p2 = pnand %p185_p1, %p182_p0 }
   0x9   :  { %190 = shalt.err (!%p187_p2)
}
   0xa   :  { %s191_s23 = scalar_lea.vmem %s38_s13, 128  ;;  %p196_p4 = scmp.lt.s32.totalorder %s38_s13, %s38_s13 }
   0xb   :  { %p192_p3 = scmp.ne.s32.totalorder %s38_s13, %s191_s23  ;;  %p197_p5 = scmp.lt.s32.totalorder %s191_s23, %s191_s23 }
   0xd   :  { %p198_p6 = por %p197_p5, %p196_p4 }
   0xf   :  { %p199_p7 = pnand %p198_p6, %p192_p3 }
  0x11   :  { %202 = shalt.err (!%p199_p7)
}
  0x12   :  { %40 = dma.hbm_to_vmem [thread:$0]  %s356_s1, 128, %s38_s13, [#allocation7]  }
  0x13   :  { %s203_s28 = scalar_lea.hbm %s355_s0, 128 }
  0x14   :  { %p204_p8 = scmp.ne.s32.totalorder %s355_s0, %s203_s28  ;;  %p207_p9 = scmp.lt.u32.totalorder %s203_s28, %s355_s0 }
  0x16   :  { %p209_p10 = pnand %p207_p9, %p204_p8 }
  0x18   :  { %212 = shalt.err (!%p209_p10)
}
  0x19   :  { %s213_s6 = scalar_lea.vmem %s23_s15, 128  ;;  %p218_p12 = scmp.lt.s32.totalorder %s23_s15, %s23_s15 }
  0x1a   :  { %p214_p11 = scmp.ne.s32.totalorder %s23_s15, %s213_s6  ;;  %p219_p13 = scmp.lt.s32.totalorder %s213_s6, %s213_s6 }
  0x1c   :  { %p220_p0 = por %p219_p13, %p218_p12 }
  0x1e   :  { %p221_p1 = pnand %p220_p0, %p214_p11 }
  0x20   :  { %224 = shalt.err (!%p221_p1)
}
  0x21   :  { %25 = dma.hbm_to_vmem [thread:$0]  %s355_s0, 128, %s23_s15, [#allocation4]  }
  0x22   :  { %s277_s8 = smov [#allocation8]   ;;  %s225_s12 = scalar_lea.hbm %s357_s2, 128 }
  0x23   :  { %s52_s9 = sshll.u32 %s277_s8, 4  ;;  %p226_p2 = scmp.ne.s32.totalorder %s357_s2, %s225_s12  ;;  %s53_s9 = int_to_ptr.vmem [resolvable:$true] %s52_s9 }
  0x24   :  { %p229_p3 = scmp.lt.u32.totalorder %s225_s12, %s357_s2 }
  0x26   :  { %p231_p4 = pnand %p229_p3, %p226_p2 }
  0x28   :  { %234 = shalt.err (!%p231_p4)
}
  0x29   :  { %s235_s18 = scalar_lea.vmem %s53_s9, 128  ;;  %p240_p6 = scmp.lt.s32.totalorder %s53_s9, %s53_s9 }
  0x2a   :  { %p236_p5 = scmp.ne.s32.totalorder %s53_s9, %s235_s18  ;;  %p241_p7 = scmp.lt.s32.totalorder %s235_s18, %s235_s18 }
  0x2c   :  { %p242_p8 = por %p241_p7, %p240_p6 }
  0x2e   :  { %p243_p9 = pnand %p242_p8, %p236_p5 }
  0x30   :  { %246 = shalt.err (!%p243_p9)
}
  0x31   :  { %55 = dma.hbm_to_vmem [thread:$0]  %s357_s2, 128, %s53_s9, [#allocation7]  }
  0x32   :  { %269 = dma.done.wait [#allocation4], 128  }
  0x33   :  { %270 = vsyncadd [#allocation4], 4294967168 }
  0x34   :  { %271 = dma.done.wait [#allocation7], 256  }
  0x35   :  { %272 = vsyncadd [#allocation7], 4294967040  ;;  %v278_v0 = vmov 0   ;;  %vm96_vm0 = vcmask 31744   ;;  %v80_v1 = vld [vmem:[#allocation3] sm:$0xff]  ;;  %v81_v3 = vld [vmem:[#allocation6] sm:$0xff]  ;;  %v90_v7 = vlaneseq }
  0x36   :  { %174 = vset.pattern.permute.xlu0 %v278_v0  ;;  %v97_v2 = vsel %vm96_vm0, %v80_v1, -inf  ;;  %vm78_vm2 = vcmask 7168   ;;  %v279_v14 = vmov 0.0   ;;  %v82_v23 = vld [vmem:[#allocation8] sm:$0xff]  ;;  %s280_s2 = smov [#allocation9]  }
  0x37   :  { %98 = vmax.xlane.f32.xlu0 %v97_v2  ;;  %v91_v8 = vand.u32 127, %v90_v7  ;;  %79 = vst.msk [vmem:[#allocation2] sm:$0xff] %vm78_vm2, %v279_v14  ;;  %v119_v25 = vsub.f32 0.0, %v82_v23  ;;  %s150_s19 = sshll.u32 %s280_s2, 4  ;;  %s151_s19 = int_to_ptr.vmem [resolvable:$true] %s150_s19 }
  0x38   :  { %s247_s21 = scalar_lea.vmem %s151_s19, 128  ;;  %p252_p11 = scmp.lt.s32.totalorder %s151_s19, %s151_s19 }
  0x39   :  { %p248_p10 = scmp.ne.s32.totalorder %s151_s19, %s247_s21  ;;  %p253_p12 = scmp.lt.s32.totalorder %s247_s21, %s247_s21 }
  0x3b   :  { %p254_p13 = por %p253_p12, %p252_p11 }
  0x3d   :  { %p255_p0 = pnand %p254_p13, %p248_p10 }
  0x3e   :  { %v122_v29 = vld [vmem:[#allocation2] sm:$0xff] }
  0x4d   :  { %93 = vperm.xlu0 %174, %v81_v3  }
  0xc4   :  { %v99_v4 = vpop.xlane.xlu0 %98 }
  0xc5   :  { %v100_v5 = vsub.f32 %v80_v1, %v99_v4 }
  0xc7   :  { %v101_v6 = vmul.f32 1.442695, %v100_v5 }
  0xc9   :  { %175 = vpow2.f32 %v101_v6 }
  0xcc   :  { %v94_v9 = vpop.permute.xlu0 %93 }
  0xcd   :  { %vm95_vm1 = vcmp.eq.s32.totalorder %v91_v8, %v94_v9 }
  0xce   :  { %v106_v11 = vsel %vm95_vm1, %v80_v1, 0.0 }
  0xcf   :  { %v107_v13 = vsel %vm96_vm0, %v106_v11, 0.0 }
  0xd3   :  { %v176_v10 = vpop.eup %175 }
  0xd4   :  { %v103_v12 = vsel %vm96_vm0, %v176_v10, 0.0 }
  0xd5   :  { %104 = vadd.xlane.f32.xlu1 %v103_v12 }
  0xd9   :  { %108 = vadd.xlane.f32.xlu1 %v107_v13 }
 0x162   :  { %v105_v15 = vpop.xlane.xlu1 %104 }
 0x163   :  { %177 = vlog2.f32 %v105_v15 }
 0x166   :  { %v109_v16 = vpop.xlane.xlu1 %108 }
 0x167   :  { %v110_v19 = vsub.f32 %v109_v16, %v99_v4 }
 0x16d   :  { %v178_v17 = vpop.eup %177 }
 0x16e   :  { %v112_v18 = vmul.f32 0.6931472, %v178_v17 }
 0x170   :  { %v113_v20 = vsub.f32 %v110_v19, %v112_v18 }
 0x172   :  { %v114_v21 = vmul.f32 1.442695, %v113_v20 }
 0x174   :  { %179 = vpow2.f32 %v114_v21 }
 0x17e   :  { %v180_v22 = vpop.eup %179 }
 0x17f   :  { %v116_v24 = vsub.f32 1.0, %v180_v22 }
 0x181   :  { %v117_v26 = vmax.f32 %v116_v24, 0.0 }
 0x183   :  { %v118_v27 = vmul.f32 %v117_v26, %v117_v26 }
 0x185   :  { %v120_v28 = vmul.f32 %v119_v25, %v118_v27 }
 0x187   :  { %v121_v30 = vmul.f32 %v120_v28, %v113_v20 }
 0x189   :  { %v124_v31 = vadd.f32 %v122_v29, %v121_v30 }
 0x18b   :  { %126 = vst.msk [vmem:[#allocation2] sm:$0xff] %vm78_vm2, %v124_v31 }
 0x192   :  { %v130_v32 = vld [vmem:[#allocation2] sm:$0xff] }
 0x193   :  { %v131_v33 = vsel %vm78_vm2, %v130_v32, 0.0 }
 0x194   :  { %132 = vadd.xlane.f32.xlu1 %v131_v33 }
 0x221   :  { %v133_v34 = vpop.xlane.xlu1 %132 }
 0x222   :  { %v134_v35 = vrot.slane %v133_v34, 4 }
 0x224   :  { %v135_v36 = vadd.f32 %v134_v35, %v133_v34 }
 0x226   :  { %v136_v37 = vrot.slane %v135_v36, 2 }
 0x228   :  { %v137_v38 = vadd.f32 %v136_v37, %v135_v36 }
 0x22a   :  { %v138_v39 = vrot.slane %v137_v38, 1 }
 0x22c   :  { %v139_v40 = vadd.f32 %v138_v39, %v137_v38 }
 0x22e   :  { %166 = vpush %v139_v40 }
 0x25f   :  { %s167_s20 = spop %166 }
 0x260   :  { %v141_v41 = vstv %s167_s20 }
 0x261   :  { %143 = vst [vmem:[#allocation9] sm:$0xff] %v141_v41 }
 0x262   :  { %258 = shalt.err (!%p255_p0)
}
 0x263   :  { %s259_s24 = scalar_lea.hbm %s358_s3, 128 }
 0x264   :  { %p260_p1 = scmp.ne.s32.totalorder %s358_s3, %s259_s24  ;;  %p263_p2 = scmp.lt.u32.totalorder %s259_s24, %s358_s3 }
 0x266   :  { %p265_p3 = pnand %p263_p2, %p260_p1 }
 0x268   :  { %268 = shalt.err (!%p265_p3)
}
 0x269   :  { %153 = dma.vmem_to_hbm [thread:$0]  %s151_s19, 128, %s358_s3, [#allocation5]  }
 0x26a   :  { %273 = dma.done.wait [#allocation5], 128  }
 0x26b   :  { %274 = vsyncadd [#allocation5], 4294967168 }
 0x26c   :  { %157 = vsyncpa [#allocation4], 1 }
 0x26d   :  { %158 = vsyncpa [#allocation7], 1 }
 0x26e   :  { %159 = vsyncpa [#allocation5], 1 }

</bundles_post_ra>
